<compile_context>
chip_gen: v7x
topology: tpu7x:2x2x1
jax: 0.10.0
libtpu: 0.0.40
codegen_flags: <defaults>
</compile_context>

<pallas_src>
import functools
import math

import jax
import jax.numpy as jnp
from jax.experimental import pallas as pl
from jax.experimental.pallas import tpu as pltpu


def _cdiv(a, b):
    return -(-a // b)


def _round_up(x, m):
    return _cdiv(x, m) * m


# ----------------------------- Pallas kernel -------------------------------

def _autoencoder_kernel(x_ref, w_ref, b_ref, latent_ref, recon_ref,
                        *, layer_meta, n_enc):
    """Fused MLP autoencoder forward on one batch tile.

    w_ref : (sum_l din_pad_l, max dout_pad) bf16  -- all layers' weights,
            concatenated along rows, each zero-padded to 128-lane tiles.
    b_ref : (L, max dout_pad) f32                 -- all layers' biases.
    layer_meta[l] = (row_offset, din_pad, dout_pad, apply_relu)  (static).
    """
    h = x_ref[...].astype(jnp.float32)            # (tile_b, din_pad_0) f32

    for l, (row, din_p, dout_p, relu) in enumerate(layer_meta):
        w = w_ref[row:row + din_p, :dout_p]       # bf16 (din_p, dout_p), 128-aligned
        b = b_ref[l:l + 1, :dout_p]               # f32  (1, dout_p)
        # bf16 x bf16 -> f32 accumulate on the MXU; bias/relu stay f32 on the VPU.
        h = jnp.dot(h.astype(jnp.bfloat16), w,
                    preferred_element_type=jnp.float32) + b
        if relu:                                  # hidden_activation = relu
            h = jnp.maximum(h, 0.0)
        if l == n_enc - 1:                        # encoder output == latent
            latent_ref[...] = h.astype(latent_ref.dtype)

    recon_ref[...] = h.astype(recon_ref.dtype)


# ----------------------------- Parameter setup -----------------------------

def _fanin_init(key, in_size, out_size):
    # ptu.fanin_init: uniform(-1/sqrt(fan_in), 1/sqrt(fan_in)); stored as [in, out]
    bound = 1.0 / math.sqrt(in_size)
    return jax.random.uniform(key, (in_size, out_size), jnp.float32, -bound, bound)


def make_mlp_params(key, input_size, hidden_sizes, output_size, init_w=0.003):
    """Mirrors Mlp.__init__ parameter shapes (weights stored transposed [in,out])."""
    params = {
        "fcs": [],
        "input_mu": jnp.zeros((1, input_size), jnp.float32),
        "input_std": jnp.ones((1, input_size), jnp.float32),
    }
    in_size = input_size
    for next_size in hidden_sizes:
        key, wk = jax.random.split(key)
        w = _fanin_init(wk, in_size, next_size)
        b = jnp.zeros((1, next_size), jnp.float32)        # b_init_value = 0.0
        params["fcs"].append((w, b))
        in_size = next_size
    key, wk, bk = jax.random.split(key, 3)
    w_last = jax.random.uniform(wk, (in_size, output_size), jnp.float32, -init_w, init_w)
    b_last = jax.random.uniform(bk, (1, output_size), jnp.float32, -init_w, init_w)
    params["last_fc"] = (w_last, b_last)
    return params


def _fold_input_norm(params):
    """Fold (x - mu)/std into layer 0's weight/bias (exact affine fold, in f32)."""
    layers = list(params["fcs"]) + [params["last_fc"]]
    mu = params["input_mu"]                               # [1, Din]
    inv_std = 1.0 / params["input_std"]
    folded = []
    for idx, (w, b) in enumerate(layers):
        if idx == 0:
            # ((x - mu) * inv_std) @ W + b == x @ (inv_std.T * W) + (b - (mu*inv_std) @ W)
            b = b - (mu * inv_std) @ w
            w = w * inv_std.T
        folded.append((w, b))
    return folded


def prepare_autoencoder(enc_params, dec_params):
    """One-time prep: fold normalization, per-layer 128-lane padding, and pack
    everything into one bf16 weight slab + one f32 bias stack."""
    enc_layers = _fold_input_norm(enc_params)
    dec_layers = _fold_input_norm(dec_params)
    layers = enc_layers + dec_layers
    n_enc, n_dec = len(enc_layers), len(dec_layers)
    n_layers = n_enc + n_dec

    meta = []
    row = 0
    max_dout_p = 0
    for idx, (w, _) in enumerate(layers):
        din, dout = w.shape
        din_p = _round_up(din, 128)
        dout_p = _round_up(dout, 128)
        relu = idx not in (n_enc - 1, n_layers - 1)       # last_fc of enc/dec: identity
        meta.append((row, din_p, dout_p, relu))
        row += din_p
        max_dout_p = max(max_dout_p, dout_p)
    total_rows = row

    # Consecutive layers must agree on the padded activation width (they do,
    # because dout_l == din_{l+1} in the true model).
    for l in range(n_layers - 1):
        assert meta[l][2] == meta[l + 1][1]

    w_cat = jnp.zeros((total_rows, max_dout_p), jnp.bfloat16)
    b_stk = jnp.zeros((n_layers, max_dout_p), jnp.float32)
    for idx, ((w, b), (r, _, _, _)) in enumerate(zip(layers, meta)):
        din, dout = w.shape
        w_cat = w_cat.at[r:r + din, :dout].set(w.astype(jnp.bfloat16))
        b_stk = b_stk.at[idx, :dout].set(b[0])

    return {
        "w_cat": w_cat,
        "b_stk": b_stk,
        "layer_meta": tuple(meta),
        "n_enc": n_enc,
        "input_size": enc_params["input_mu"].shape[1],
        "embed_size": enc_params["last_fc"][0].shape[1],
        "output_size": dec_params["last_fc"][0].shape[1],
        "din_pad": meta[0][1],
        "embed_pad": meta[n_enc - 1][2],
        "out_pad": meta[-1][2],
    }


# ------------------------------ Fused forward -------------------------------

def mlp_autoencoder_forward(fused, x, *, tile_b=256):
    """Single fused pallas_call for the whole autoencoder forward."""
    w_cat, b_stk = fused["w_cat"], fused["b_stk"]
    meta, n_enc = fused["layer_meta"], fused["n_enc"]
    din, din_p = fused["input_size"], fused["din_pad"]
    embed_p, out_p = fused["embed_pad"], fused["out_pad"]

    B = x.shape[0]
    b_pad = _round_up(B, 8)

    # Batch tile: multiple of 8; force >= 2 grid steps when B >= 16 so
    # dimension_semantics=("parallel",) can shard across v7x's two TensorCores.
    tb = _round_up(max(8, min(tile_b, b_pad)), 8)
    if b_pad >= 16 and _cdiv(b_pad, tb) < 2:
        tb = _round_up(_cdiv(b_pad, 2), 8)
    grid = (_cdiv(b_pad, tb),)

    # Pad only the batch (to a multiple of 8) and the first layer's feature
    # width (to 128); a ragged last batch block is masked by Pallas.
    if (B, x.shape[1]) == (b_pad, din_p):
        x_in = x.astype(jnp.float32)
    else:
        x_in = jnp.zeros((b_pad, din_p), jnp.float32).at[:B, :din].set(x)

    x_spec = pl.BlockSpec((tb, din_p), lambda i: (i, 0))
    w_spec = pl.BlockSpec(w_cat.shape, lambda i: (0, 0))       # VMEM-resident
    b_spec = pl.BlockSpec(b_stk.shape, lambda i: (0, 0))       # VMEM-resident
    latent_spec = pl.BlockSpec((tb, embed_p), lambda i: (i, 0))
    recon_spec = pl.BlockSpec((tb, out_p), lambda i: (i, 0))

    # Advisory cost model (padded matmul flops / bytes actually moved).
    flops = 2 * b_pad * sum(dp * op for (_, dp, op, _) in meta)
    bytes_accessed = (x_in.size * 4 + w_cat.size * 2 + b_stk.size * 4
                      + b_pad * embed_p * 4 + b_pad * out_p * 4)
    cost = pl.CostEstimate(flops=int(flops), transcendentals=0,
                           bytes_accessed=int(bytes_accessed))

    # Explicit VMEM limit only when the footprint approaches v7x's 32 MiB
    # scoped default (pipeline double-buffers each operand).
    max_w = max(op for (_, _, op, _) in meta)
    footprint = (2 * (w_cat.size * 2 + b_stk.size * 4)
                 + 2 * tb * (din_p + embed_p + out_p) * 4
                 + 2 * tb * max_w * 4)
    vmem_limit = None
    if footprint > (24 << 20):
        vmem_limit = int(min(100 << 20, footprint + (8 << 20)))

    kernel = functools.partial(_autoencoder_kernel, layer_meta=meta, n_enc=n_enc)
    latent_pad, recon_pad = pl.pallas_call(
        kernel,
        out_shape=(
            jax.ShapeDtypeStruct((b_pad, embed_p), jnp.float32),
            jax.ShapeDtypeStruct((b_pad, out_p), jnp.float32),
        ),
        grid_spec=pltpu.PrefetchScalarGridSpec(
            num_scalar_prefetch=0,
            grid=grid,
            in_specs=[x_spec, w_spec, b_spec],
            out_specs=[latent_spec, recon_spec],
        ),
        compiler_params=pltpu.CompilerParams(
            dimension_semantics=("parallel",),
            vmem_limit_bytes=vmem_limit,
        ),
        cost_estimate=cost,
    )(x_in, w_cat, b_stk)

    latent = latent_pad[:B, :fused["embed_size"]]
    recon = recon_pad[:B, :fused["output_size"]]
    return latent, recon


# ------------------------------ Reference (JAX) ----------------------------

def _mlp_forward_ref(params, x):
    h = (x - params["input_mu"]) / params["input_std"]
    for (w, b) in params["fcs"]:
        h = jnp.maximum(h @ w + b, 0.0)
    w_last, b_last = params["last_fc"]
    return h @ w_last + b_last


# --------------------------------- Main ------------------------------------

if __name__ == "__main__":
    # Small shapes consistent with the module.
    batch = 8
    input_size = 32
    hidden_sizes = (64, 64)
    embed_size = 16

    key = jax.random.PRNGKey(0)
    k_enc, k_dec, k_x, k_mu, k_std = jax.random.split(key, 5)

    enc_params = make_mlp_params(k_enc, input_size, hidden_sizes, embed_size)
    dec_params = make_mlp_params(k_dec, embed_size, hidden_sizes, input_size)

    # Non-trivial input stats on the encoder to exercise the normalization fold.
    enc_params["input_mu"] = 0.1 * jax.random.normal(k_mu, (1, input_size), jnp.float32)
    enc_params["input_std"] = jax.random.uniform(
        k_std, (1, input_size), jnp.float32, 0.5, 1.5)

    x = jax.random.normal(k_x, (batch, input_size), jnp.float32)

    fused = prepare_autoencoder(enc_params, dec_params)
    latent, recon = mlp_autoencoder_forward(fused, x)
    jax.block_until_ready((latent, recon))

    # Sanity check against a pure-JAX f32 reference (original, unfolded params).
    latent_ref = _mlp_forward_ref(enc_params, x)
    recon_ref = _mlp_forward_ref(dec_params, latent_ref)
    assert latent.shape == (batch, embed_size)
    assert recon.shape == (batch, input_size)
    # bf16-weight MXU path vs f32 reference -> loose but meaningful tolerance.
    assert jnp.allclose(latent, latent_ref, atol=2e-2, rtol=2e-2), \
        float(jnp.max(jnp.abs(latent - latent_ref)))
    assert jnp.allclose(recon, recon_ref, atol=2e-2, rtol=2e-2), \
        float(jnp.max(jnp.abs(recon - recon_ref)))

    print("KERNEL_OK")
</pallas_src>

<mosaic_0001>
module attributes {stable_mosaic.version = 11 : i64} {
  func.func @_autoencoder_kernel(%arg0: i32, %arg1: memref<8x128xf32, #tpu.memory_space<vmem>>, %arg2: memref<768x128xbf16, #tpu.memory_space<vmem>>, %arg3: memref<6x128xf32, #tpu.memory_space<vmem>>, %arg4: memref<8x128xf32, #tpu.memory_space<vmem>>, %arg5: memref<8x128xf32, #tpu.memory_space<vmem>>) attributes {dimension_semantics = [#tpu.dimension_semantics<parallel>], iteration_bounds = array<i64: 1>, scalar_prefetch = 0 : i64, scratch_operands = 0 : i64, tpu.core_type = #tpu.core_type<tc>, window_params = [{transform_indices = @transform_0, window_bounds = array<i64: 8, 128>}, {pipeline_mode = #tpu.pipeline_mode<synchronous>, transform_indices = @transform_1, window_bounds = array<i64: 768, 128>}, {pipeline_mode = #tpu.pipeline_mode<synchronous>, transform_indices = @transform_2, window_bounds = array<i64: 6, 128>}, {transform_indices = @transform_3, window_bounds = array<i64: 8, 128>}, {transform_indices = @transform_4, window_bounds = array<i64: 8, 128>}]} {
    %c0 = arith.constant 0 : index
    %c0_0 = arith.constant 0 : index
    %0 = vector.load %arg1[%c0, %c0_0] : memref<8x128xf32, #tpu.memory_space<vmem>>, vector<8x128xf32>
    %c0_1 = arith.constant 0 : index
    %c0_2 = arith.constant 0 : index
    %1 = vector.load %arg2[%c0_1, %c0_2] : memref<768x128xbf16, #tpu.memory_space<vmem>>, vector<128x128xbf16>
    %c0_3 = arith.constant 0 : index
    %c0_4 = arith.constant 0 : index
    %2 = vector.load %arg3[%c0_3, %c0_4] : memref<6x128xf32, #tpu.memory_space<vmem>>, vector<1x128xf32>
    %3 = arith.truncf %0 : vector<8x128xf32> to vector<8x128xbf16>
    %cst = arith.constant dense<0.000000e+00> : vector<8x128xf32>
    %4 = tpu.matmul %3, %1, %cst {dimension_numbers = #tpu.dot_dimension_numbers<[1], [0], [0], [1], [0, 0, 1, 1], [], []>} : vector<8x128xbf16>, vector<128x128xbf16>, vector<8x128xf32> -> vector<8x128xf32>
    %5 = vector.broadcast %2 : vector<1x128xf32> to vector<8x128xf32>
    %6 = arith.addf %4, %5 : vector<8x128xf32>
    %cst_5 = arith.constant 0.000000e+00 : f32
    %7 = vector.broadcast %cst_5 : f32 to vector<8x128xf32>
    %8 = arith.maximumf %6, %7 : vector<8x128xf32>
    %c128 = arith.constant 128 : index
    %c0_6 = arith.constant 0 : index
    %9 = vector.load %arg2[%c128, %c0_6] : memref<768x128xbf16, #tpu.memory_space<vmem>>, vector<128x128xbf16>
    %c1 = arith.constant 1 : index
    %c0_7 = arith.constant 0 : index
    %10 = vector.load %arg3[%c1, %c0_7] : memref<6x128xf32, #tpu.memory_space<vmem>>, vector<1x128xf32>
    %11 = arith.truncf %8 : vector<8x128xf32> to vector<8x128xbf16>
    %cst_8 = arith.constant dense<0.000000e+00> : vector<8x128xf32>
    %12 = tpu.matmul %11, %9, %cst_8 {dimension_numbers = #tpu.dot_dimension_numbers<[1], [0], [0], [1], [0, 0, 1, 1], [], []>} : vector<8x128xbf16>, vector<128x128xbf16>, vector<8x128xf32> -> vector<8x128xf32>
    %13 = vector.broadcast %10 : vector<1x128xf32> to vector<8x128xf32>
    %14 = arith.addf %12, %13 : vector<8x128xf32>
    %cst_9 = arith.constant 0.000000e+00 : f32
    %15 = vector.broadcast %cst_9 : f32 to vector<8x128xf32>
    %16 = arith.maximumf %14, %15 : vector<8x128xf32>
    %c256 = arith.constant 256 : index
    %c0_10 = arith.constant 0 : index
    %17 = vector.load %arg2[%c256, %c0_10] : memref<768x128xbf16, #tpu.memory_space<vmem>>, vector<128x128xbf16>
    %c2 = arith.constant 2 : index
    %c0_11 = arith.constant 0 : index
    %18 = vector.load %arg3[%c2, %c0_11] : memref<6x128xf32, #tpu.memory_space<vmem>>, vector<1x128xf32>
    %19 = arith.truncf %16 : vector<8x128xf32> to vector<8x128xbf16>
    %cst_12 = arith.constant dense<0.000000e+00> : vector<8x128xf32>
    %20 = tpu.matmul %19, %17, %cst_12 {dimension_numbers = #tpu.dot_dimension_numbers<[1], [0], [0], [1], [0, 0, 1, 1], [], []>} : vector<8x128xbf16>, vector<128x128xbf16>, vector<8x128xf32> -> vector<8x128xf32>
    %21 = vector.broadcast %18 : vector<1x128xf32> to vector<8x128xf32>
    %22 = arith.addf %20, %21 : vector<8x128xf32>
    %c0_13 = arith.constant 0 : index
    %c0_14 = arith.constant 0 : index
    %23 = vector.load %arg4[%c0_13, %c0_14] : memref<8x128xf32, #tpu.memory_space<vmem>>, vector<8x128xf32>
    tpu.vector_store %arg4[%c0_13, %c0_14], %22 {strides = array<i32>} : memref<8x128xf32, #tpu.memory_space<vmem>>, vector<8x128xf32>,
    %c384 = arith.constant 384 : index
    %c0_15 = arith.constant 0 : index
    %24 = vector.load %arg2[%c384, %c0_15] : memref<768x128xbf16, #tpu.memory_space<vmem>>, vector<128x128xbf16>
    %c3 = arith.constant 3 : index
    %c0_16 = arith.constant 0 : index
    %25 = vector.load %arg3[%c3, %c0_16] : memref<6x128xf32, #tpu.memory_space<vmem>>, vector<1x128xf32>
    %26 = arith.truncf %22 : vector<8x128xf32> to vector<8x128xbf16>
    %cst_17 = arith.constant dense<0.000000e+00> : vector<8x128xf32>
    %27 = tpu.matmul %26, %24, %cst_17 {dimension_numbers = #tpu.dot_dimension_numbers<[1], [0], [0], [1], [0, 0, 1, 1], [], []>} : vector<8x128xbf16>, vector<128x128xbf16>, vector<8x128xf32> -> vector<8x128xf32>
    %28 = vector.broadcast %25 : vector<1x128xf32> to vector<8x128xf32>
    %29 = arith.addf %27, %28 : vector<8x128xf32>
    %cst_18 = arith.constant 0.000000e+00 : f32
    %30 = vector.broadcast %cst_18 : f32 to vector<8x128xf32>
    %31 = arith.maximumf %29, %30 : vector<8x128xf32>
    %c512 = arith.constant 512 : index
    %c0_19 = arith.constant 0 : index
    %32 = vector.load %arg2[%c512, %c0_19] : memref<768x128xbf16, #tpu.memory_space<vmem>>, vector<128x128xbf16>
    %c4 = arith.constant 4 : index
    %c0_20 = arith.constant 0 : index
    %33 = vector.load %arg3[%c4, %c0_20] : memref<6x128xf32, #tpu.memory_space<vmem>>, vector<1x128xf32>
    %34 = arith.truncf %31 : vector<8x128xf32> to vector<8x128xbf16>
    %cst_21 = arith.constant dense<0.000000e+00> : vector<8x128xf32>
    %35 = tpu.matmul %34, %32, %cst_21 {dimension_numbers = #tpu.dot_dimension_numbers<[1], [0], [0], [1], [0, 0, 1, 1], [], []>} : vector<8x128xbf16>, vector<128x128xbf16>, vector<8x128xf32> -> vector<8x128xf32>
    %36 = vector.broadcast %33 : vector<1x128xf32> to vector<8x128xf32>
    %37 = arith.addf %35, %36 : vector<8x128xf32>
    %cst_22 = arith.constant 0.000000e+00 : f32
    %38 = vector.broadcast %cst_22 : f32 to vector<8x128xf32>
    %39 = arith.maximumf %37, %38 : vector<8x128xf32>
    %c640 = arith.constant 640 : index
    %c0_23 = arith.constant 0 : index
    %40 = vector.load %arg2[%c640, %c0_23] : memref<768x128xbf16, #tpu.memory_space<vmem>>, vector<128x128xbf16>
    %c5 = arith.constant 5 : index
    %c0_24 = arith.constant 0 : index
    %41 = vector.load %arg3[%c5, %c0_24] : memref<6x128xf32, #tpu.memory_space<vmem>>, vector<1x128xf32>
    %42 = arith.truncf %39 : vector<8x128xf32> to vector<8x128xbf16>
    %cst_25 = arith.constant dense<0.000000e+00> : vector<8x128xf32>
    %43 = tpu.matmul %42, %40, %cst_25 {dimension_numbers = #tpu.dot_dimension_numbers<[1], [0], [0], [1], [0, 0, 1, 1], [], []>} : vector<8x128xbf16>, vector<128x128xbf16>, vector<8x128xf32> -> vector<8x128xf32>
    %44 = vector.broadcast %41 : vector<1x128xf32> to vector<8x128xf32>
    %45 = arith.addf %43, %44 : vector<8x128xf32>
    %c0_26 = arith.constant 0 : index
    %c0_27 = arith.constant 0 : index
    %46 = vector.load %arg5[%c0_26, %c0_27] : memref<8x128xf32, #tpu.memory_space<vmem>>, vector<8x128xf32>
    tpu.vector_store %arg5[%c0_26, %c0_27], %45 {strides = array<i32>} : memref<8x128xf32, #tpu.memory_space<vmem>>, vector<8x128xf32>,
    return
  }
  func.func @transform_0(%arg0: i32) -> (i32, i32) {
    %c0_i32 = arith.constant 0 : i32
    %c0_i32_0 = arith.constant 0 : i32
    return %arg0, %c0_i32 : i32, i32
  }
  func.func @transform_1(%arg0: i32) -> (i32, i32) {
    %c0_i32 = arith.constant 0 : i32
    %c0_i32_0 = arith.constant 0 : i32
    %c0_i32_1 = arith.constant 0 : i32
    return %c0_i32, %c0_i32_0 : i32, i32
  }
  func.func @transform_2(%arg0: i32) -> (i32, i32) {
    %c0_i32 = arith.constant 0 : i32
    %c0_i32_0 = arith.constant 0 : i32
    %c0_i32_1 = arith.constant 0 : i32
    return %c0_i32, %c0_i32_0 : i32, i32
  }
  func.func @transform_3(%arg0: i32) -> (i32, i32) {
    %c0_i32 = arith.constant 0 : i32
    %c0_i32_0 = arith.constant 0 : i32
    return %arg0, %c0_i32 : i32, i32
  }
  func.func @transform_4(%arg0: i32) -> (i32, i32) {
    %c0_i32 = arith.constant 0 : i32
    %c0_i32_0 = arith.constant 0 : i32
    return %arg0, %c0_i32 : i32, i32
  }
}

</mosaic_0001>

<bundles_post_ra>
// kernel: tpu_custom_call.1
= control target key start
LH: loop header
LB: loop body
LE: loop exit
PB: predicated region body
PF: predicated region fallthrough
CT: control target
= control target key end

     0   :  { %10 = vsyncpa [#allocation3], 0  ;;  %s1310_s0 = inlined_call_operand.hbm [shape: f32[8,128], index: 0, kind: input, shape index: {}]   ;;  %s1311_s1 = inlined_call_operand.hbm [shape: bf16[768,128], index: 1, kind: input, shape index: {}]   ;;  %s1312_s2 = inlined_call_operand.hbm [shape: f32[6,128], index: 2, kind: input, shape index: {}]   ;;  %s1313_s3 = inlined_call_operand.hbm [shape: f32[8,128], index: 3, kind: output, shape index: {0}]   ;;  %s1314_s4 = inlined_call_operand.hbm [shape: f32[8,128], index: 4, kind: output, shape index: {1}]  }
   0x1   :  { %11 = vsyncpa [#allocation6], 0 }
   0x2   :  { %12 = vsyncpa [#allocation4], 0 }
   0x3   :  { %13 = vsyncpa [#allocation10], 0  ;;  %s1156_s15 = smov [#allocation5]   ;;  %s1038_s19 = scalar_lea.hbm %s1311_s1, 6144 }
   0x4   :  { %s29_s16 = sshll.u32 %s1156_s15, 4  ;;  %p1039_p0 = scmp.ne.s32.totalorder %s1311_s1, %s1038_s19  ;;  %s30_s16 = int_to_ptr.vmem [resolvable:$true] %s29_s16 }
   0x5   :  { %p1042_p1 = scmp.lt.u32.totalorder %s1038_s19, %s1311_s1 }
   0x7   :  { %p1044_p2 = pnand %p1042_p1, %p1039_p0 }
   0x9   :  { %1047 = shalt.err (!%p1044_p2)
}
   0xa   :  { %s1048_s24 = scalar_lea.vmem %s30_s16, 6144  ;;  %p1053_p4 = scmp.lt.s32.totalorder %s30_s16, %s30_s16 }
   0xb   :  { %p1049_p3 = scmp.ne.s32.totalorder %s30_s16, %s1048_s24  ;;  %p1054_p5 = scmp.lt.s32.totalorder %s1048_s24, %s1048_s24 }
   0xd   :  { %p1055_p6 = por %p1054_p5, %p1053_p4 }
   0xf   :  { %p1056_p7 = pnand %p1055_p6, %p1049_p3 }
  0x11   :  { %1059 = shalt.err (!%p1056_p7)
}
  0x12   :  { %s1157_s25 = smov 64   ;;  %s1158_s26 = smov 4  }
  0x13   :  { %35 = dma.hbm_to_vmem [thread:$0]  %s1311_s1, 6144, %s30_s16, [#allocation6], %s1157_s25, %s1157_s25, %s1158_s26  }
  0x14   :  { %s1159_s29 = smov [#allocation2]   ;;  %s1160_s5 = smov [#allocation7]  }
  0x15   :  { %s20_s30 = sshll.u32 %s1159_s29, 4  ;;  %s42_s6 = sshll.u32 %s1160_s5, 4  ;;  %s21_s30 = int_to_ptr.vmem [resolvable:$true] %s20_s30  ;;  %s43_s6 = int_to_ptr.vmem [resolvable:$true] %s42_s6 }
  0x16   :  { %s1060_s9 = scalar_lea.hbm %s1310_s0, 128 }
  0x17   :  { %p1061_p8 = scmp.ne.s32.totalorder %s1310_s0, %s1060_s9  ;;  %p1064_p9 = scmp.lt.u32.totalorder %s1060_s9, %s1310_s0 }
  0x19   :  { %p1066_p10 = pnand %p1064_p9, %p1061_p8 }
  0x1b   :  { %1069 = shalt.err (!%p1066_p10)
}
  0x1c   :  { %s1070_s1 = scalar_lea.vmem %s21_s30, 128  ;;  %p1075_p12 = scmp.lt.s32.totalorder %s21_s30, %s21_s30 }
  0x1d   :  { %p1071_p11 = scmp.ne.s32.totalorder %s21_s30, %s1070_s1  ;;  %p1076_p13 = scmp.lt.s32.totalorder %s1070_s1, %s1070_s1 }
  0x1f   :  { %p1077_p0 = por %p1076_p13, %p1075_p12 }
  0x21   :  { %p1078_p1 = pnand %p1077_p0, %p1071_p11 }
  0x23   :  { %1081 = shalt.err (!%p1078_p1)
}
  0x24   :  { %23 = dma.hbm_to_vmem [thread:$0]  %s1310_s0, 128, %s21_s30, [#allocation3]  }
  0x25   :  { %s1082_s18 = scalar_lea.hbm %s1312_s2, 128 }
  0x26   :  { %p1083_p2 = scmp.ne.s32.totalorder %s1312_s2, %s1082_s18  ;;  %p1086_p3 = scmp.lt.u32.totalorder %s1082_s18, %s1312_s2 }
  0x28   :  { %p1088_p4 = pnand %p1086_p3, %p1083_p2 }
  0x2a   :  { %1091 = shalt.err (!%p1088_p4)
}
  0x2b   :  { %s1092_s23 = scalar_lea.vmem %s43_s6, 128  ;;  %p1097_p6 = scmp.lt.s32.totalorder %s43_s6, %s43_s6 }
  0x2c   :  { %p1093_p5 = scmp.ne.s32.totalorder %s43_s6, %s1092_s23  ;;  %p1098_p7 = scmp.lt.s32.totalorder %s1092_s23, %s1092_s23 }
  0x2e   :  { %p1099_p8 = por %p1098_p7, %p1097_p6 }
  0x30   :  { %p1100_p9 = pnand %p1099_p8, %p1093_p5 }
  0x32   :  { %1103 = shalt.err (!%p1100_p9)
}
  0x33   :  { %45 = dma.hbm_to_vmem [thread:$0]  %s1312_s2, 128, %s43_s6, [#allocation6]  }
  0x34   :  { %1148 = dma.done.wait [#allocation3], 128  }
  0x35   :  { %1149 = vsyncadd [#allocation3], 4294967168 }
  0x36   :  { %1150 = dma.done.wait [#allocation6], 6272  }
  0x37   :  { %1151 = vsyncadd [#allocation6], 4294961024  ;;  %v1161_v0 = vmov 0.0   ;;  %vm1162_vm0 = vmmov 0   ;;  %v990_v1 = vld [vmem:[#allocation5] sm:$0xff]   ;;  %v991_v2 = vld [vmem:[#allocation5 + $0x8] sm:$0xff]  }
  0x38   :  { %861 = vmatprep.subr.bf16.mxu0 %v1161_v0  ;;  %877 = vmatprep.mubr.msk.bf16.mxu0 %vm1162_vm0, %v1161_v0  ;;  %v992_v3 = vld [vmem:[#allocation5 + $0x10] sm:$0xff]   ;;  %v998_v4 = vld [vmem:[#allocation5 + $0x40] sm:$0xff]   ;;  %v993_v5 = vld [vmem:[#allocation5 + $0x18] sm:$0xff]   ;;  %s1163_s2 = smov [#allocation8]  }
  0x39   :  { %881 = vmatprep.subr.bf16.mxu1 %v1161_v0  ;;  %897 = vmatprep.mubr.msk.bf16.mxu1 %vm1162_vm0, %v1161_v0  ;;  %v999_v6 = vld [vmem:[#allocation5 + $0x48] sm:$0xff]   ;;  %v994_v7 = vld [vmem:[#allocation5 + $0x20] sm:$0xff]   ;;  %v1000_v8 = vld [vmem:[#allocation5 + $0x50] sm:$0xff]   ;;  %s729_s25 = sshll.u32 %s1163_s2, 4  ;;  %s730_s25 = int_to_ptr.vmem [resolvable:$true] %s729_s25 }
  0x3a   :  { %862 = vmatpush3.bf16.msra.mxu0 %v990_v1  ;;  %882 = vmatpush3.bf16.msra.mxu1 %v998_v4  ;;  %v995_v9 = vld [vmem:[#allocation5 + $0x28] sm:$0xff]   ;;  %v1001_v10 = vld [vmem:[#allocation5 + $0x58] sm:$0xff]   ;;  %v996_v11 = vld [vmem:[#allocation5 + $0x30] sm:$0xff]   ;;  %s1104_s26 = scalar_lea.vmem %s730_s25, 128  ;;  %p1109_p11 = scmp.lt.s32.totalorder %s730_s25, %s730_s25 }
  0x3b   :  { %863 = vmatprep.subr.bf16.mxu0 %v1161_v0  ;;  %883 = vmatprep.subr.bf16.mxu1 %v1161_v0  ;;  %v1002_v12 = vld [vmem:[#allocation5 + $0x60] sm:$0xff]   ;;  %v997_v13 = vld [vmem:[#allocation5 + $0x38] sm:$0xff]   ;;  %v1003_v15 = vld [vmem:[#allocation5 + $0x68] sm:$0xff]   ;;  %p1105_p10 = scmp.ne.s32.totalorder %s730_s25, %s1104_s26  ;;  %p1110_p12 = scmp.lt.s32.totalorder %s1104_s26, %s1104_s26 }
  0x3c   :  { %v56_v14 = vld [vmem:[#allocation2] sm:$0xff]  ;;  %v1004_v17 = vld [vmem:[#allocation5 + $0x70] sm:$0xff]   ;;  %v1006_v19 = vld [vmem:[#allocation5 + $0x80] sm:$0xff]  }
  0x3d   :  { %v74_v16 = vpack.c.bf16 %v56_v14, %v56_v14  ;;  %v1005_v18 = vld [vmem:[#allocation5 + $0x78] sm:$0xff]   ;;  %v1007_v20 = vld [vmem:[#allocation5 + $0x88] sm:$0xff]   ;;  %v1008_v21 = vld [vmem:[#allocation5 + $0x90] sm:$0xff]   ;;  %p1111_p13 = por %p1110_p12, %p1109_p11 }
  0x3e   :  { %864 = vmatpush3.bf16.msra.mxu0 %v991_v2  ;;  %884 = vmatpush3.bf16.msra.mxu1 %v999_v6  ;;  %v1009_v22 = vld [vmem:[#allocation5 + $0x98] sm:$0xff]   ;;  %v1010_v23 = vld [vmem:[#allocation5 + $0xa0] sm:$0xff]   ;;  %v1011_v24 = vld [vmem:[#allocation5 + $0xa8] sm:$0xff]  }
  0x3f   :  { %865 = vmatprep.subr.bf16.mxu0 %v1161_v0  ;;  %885 = vmatprep.subr.bf16.mxu1 %v1161_v0  ;;  %v753_v25 = vld [vmem:[#allocation7] ss:$0 sm:$0xff]  ;;  %v1012_v33 = vld [vmem:[#allocation5 + $0xb0] sm:$0xff]   ;;  %v1013_v34 = vld [vmem:[#allocation5 + $0xb8] sm:$0xff]   ;;  %p1112_p0 = pnand %p1111_p13, %p1105_p10 }
  0x40   :  { %v1014_v35 = vld [vmem:[#allocation5 + $0xc0] sm:$0xff]   ;;  %v1015_v36 = vld [vmem:[#allocation5 + $0xc8] sm:$0xff]   ;;  %v1016_v37 = vld [vmem:[#allocation5 + $0xd0] sm:$0xff]  }
  0x41   :  { %v1017_v38 = vld [vmem:[#allocation5 + $0xd8] sm:$0xff]   ;;  %v1018_v39 = vld [vmem:[#allocation5 + $0xe0] sm:$0xff]   ;;  %v1019_v40 = vld [vmem:[#allocation5 + $0xe8] sm:$0xff]  }
  0x42   :  { %866 = vmatpush3.bf16.msra.mxu0 %v992_v3  ;;  %886 = vmatpush3.bf16.msra.mxu1 %v1000_v8  ;;  %v1020_v41 = vld [vmem:[#allocation5 + $0xf0] sm:$0xff]   ;;  %v762_v42 = vld [vmem:[#allocation7 + $0x1] ss:$0 sm:$0xff]  ;;  %v1021_v50 = vld [vmem:[#allocation5 + $0xf8] sm:$0xff]  }
  0x43   :  { %867 = vmatprep.subr.bf16.mxu0 %v1161_v0  ;;  %887 = vmatprep.subr.bf16.mxu1 %v1161_v0  ;;  %v1022_v51 = vld [vmem:[#allocation5 + $0x100] sm:$0xff]   ;;  %v1023_v52 = vld [vmem:[#allocation5 + $0x108] sm:$0xff]   ;;  %v1024_v53 = vld [vmem:[#allocation5 + $0x110] sm:$0xff]  }
  0x44   :  { %v1025_v54 = vld [vmem:[#allocation5 + $0x118] sm:$0xff]   ;;  %v1026_v55 = vld [vmem:[#allocation5 + $0x120] sm:$0xff]   ;;  %v1027_v56 = vld [vmem:[#allocation5 + $0x128] sm:$0xff]  }
  0x45   :  { %v771_v57 = vld [vmem:[#allocation7 + $0x2] ss:$0 sm:$0xff]  ;;  %v1028_v1 = vld [vmem:[#allocation5 + $0x130] sm:$0xff]   ;;  %v1029_v2 = vld [vmem:[#allocation5 + $0x138] sm:$0xff]  }
  0x46   :  { %868 = vmatpush3.bf16.msra.mxu0 %v993_v5  ;;  %888 = vmatpush3.bf16.msra.mxu1 %v1001_v10  ;;  %v1030_v3 = vld [vmem:[#allocation5 + $0x140] sm:$0xff]   ;;  %v1031_v4 = vld [vmem:[#allocation5 + $0x148] sm:$0xff]   ;;  %v1032_v5 = vld [vmem:[#allocation5 + $0x150] sm:$0xff]  }
  0x47   :  { %869 = vmatprep.subr.bf16.mxu0 %v1161_v0  ;;  %889 = vmatprep.subr.bf16.mxu1 %v1161_v0  ;;  %v1033_v6 = vld [vmem:[#allocation5 + $0x158] sm:$0xff]   ;;  %v1035_v8 = vld [vmem:[#allocation5 + $0x168] sm:$0xff]  }
  0x4a   :  { %870 = vmatpush3.bf16.msra.mxu0 %v994_v7  ;;  %890 = vmatpush3.bf16.msra.mxu1 %v1002_v12  ;;  %v1034_v7 = vld [vmem:[#allocation5 + $0x160] sm:$0xff]  }
  0x4b   :  { %871 = vmatprep.subr.bf16.mxu0 %v1161_v0  ;;  %891 = vmatprep.subr.bf16.mxu1 %v1161_v0 }
  0x4e   :  { %872 = vmatpush3.bf16.msra.mxu0 %v995_v9  ;;  %892 = vmatpush3.bf16.msra.mxu1 %v1003_v15  ;;  %v780_v9 = vld [vmem:[#allocation7 + $0x3] ss:$0 sm:$0xff] }
  0x4f   :  { %873 = vmatprep.subr.bf16.mxu0 %v1161_v0  ;;  %893 = vmatprep.subr.bf16.mxu1 %v1161_v0 }
  0x52   :  { %874 = vmatpush3.bf16.msra.mxu0 %v996_v11  ;;  %894 = vmatpush3.bf16.msra.mxu1 %v1004_v17  ;;  %v1036_v17 = vld [vmem:[#allocation5 + $0x170] sm:$0xff]  }
  0x53   :  { %875 = vmatprep.subr.bf16.mxu0 %v1161_v0  ;;  %895 = vmatprep.subr.bf16.mxu1 %v1161_v0 }
  0x56   :  { %876 = vmatpush3.bf16.msra.mxu0 %v997_v13  ;;  %896 = vmatpush3.bf16.msra.mxu1 %v1005_v18  ;;  %v1037_v18 = vld [vmem:[#allocation5 + $0x178] sm:$0xff]  }
  0x57   :  { %901 = vmatprep.subr.bf16.mxu0 %v1161_v0  ;;  %921 = vmatprep.subr.bf16.mxu1 %v1161_v0 }
  0x59   :  { %878 = vmatmul.mubr.bf16.vlgmr.msra.gmra.mrb[0].mxu0 %v74_v16 }
  0x5a   :  { %917 = vmatprep.mubr.msk.bf16.mxu0 %vm1162_vm0, %v1161_v0  ;;  %902 = vmatpush3.bf16.msra.mxu0 %v1006_v19  ;;  %v789_v19 = vld [vmem:[#allocation7 + $0x4] ss:$0 sm:$0xff] }
  0x5b   :  { %903 = vmatprep.subr.bf16.mxu0 %v1161_v0 }
  0x5e   :  { %904 = vmatpush3.bf16.msra.mxu0 %v1007_v20 }
  0x5f   :  { %905 = vmatprep.subr.bf16.mxu0 %v1161_v0 }
  0x62   :  { %906 = vmatpush3.bf16.msra.mxu0 %v1008_v21 }
  0x63   :  { %907 = vmatprep.subr.bf16.mxu0 %v1161_v0 }
  0x66   :  { %908 = vmatpush3.bf16.msra.mxu0 %v1009_v22 }
  0x67   :  { %909 = vmatprep.subr.bf16.mxu0 %v1161_v0 }
  0x6a   :  { %910 = vmatpush3.bf16.msra.mxu0 %v1010_v23 }
  0x6b   :  { %911 = vmatprep.subr.bf16.mxu0 %v1161_v0 }
  0x6e   :  { %912 = vmatpush3.bf16.msra.mxu0 %v1011_v24 }
  0x6f   :  { %913 = vmatprep.subr.bf16.mxu0 %v1161_v0 }
  0x72   :  { %914 = vmatpush3.bf16.msra.mxu0 %v1012_v33 }
  0x73   :  { %915 = vmatprep.subr.bf16.mxu0 %v1161_v0 }
  0x76   :  { %916 = vmatpush3.bf16.msra.mxu0 %v1013_v34 }
  0x77   :  { %941 = vmatprep.subr.bf16.mxu0 %v1161_v0 }
 0x12c   :  { %v161_v26 = vpop.f32.mrb[0].mxu0 }
 0x12d   :  { %v162_v27 = vadd.f32 %v753_v25, %v161_v26  ;;  %v879_v28 = vpop.f32.mrb[1].mxu0 }
 0x12e   :  { %v164_v29 = vpop.f32.mrb[2].mxu0 }
 0x12f   :  { %v167_v30 = vmax.f32 %v162_v27, 0.0  ;;  %v880_v31 = vpop.f32.mrb[3].mxu0 }
 0x131   :  { %v185_v32 = vpack.c.bf16 %v167_v30, %v167_v30 }
 0x133   :  { %898 = vmatmul.mubr.bf16.vlgmr.msra.gmra.mrb[0].mxu1 %v185_v32 }
 0x134   :  { %937 = vmatprep.mubr.msk.bf16.mxu1 %vm1162_vm0, %v1161_v0  ;;  %922 = vmatpush3.bf16.msra.mxu1 %v1014_v35 }
 0x135   :  { %923 = vmatprep.subr.bf16.mxu1 %v1161_v0 }
 0x138   :  { %924 = vmatpush3.bf16.msra.mxu1 %v1015_v36 }
 0x139   :  { %925 = vmatprep.subr.bf16.mxu1 %v1161_v0 }
 0x13c   :  { %926 = vmatpush3.bf16.msra.mxu1 %v1016_v37 }
 0x13d   :  { %927 = vmatprep.subr.bf16.mxu1 %v1161_v0 }
 0x140   :  { %928 = vmatpush3.bf16.msra.mxu1 %v1017_v38 }
 0x141   :  { %929 = vmatprep.subr.bf16.mxu1 %v1161_v0 }
 0x144   :  { %930 = vmatpush3.bf16.msra.mxu1 %v1018_v39 }
 0x145   :  { %931 = vmatprep.subr.bf16.mxu1 %v1161_v0 }
 0x148   :  { %932 = vmatpush3.bf16.msra.mxu1 %v1019_v40 }
 0x149   :  { %933 = vmatprep.subr.bf16.mxu1 %v1161_v0 }
 0x14c   :  { %934 = vmatpush3.bf16.msra.mxu1 %v1020_v41 }
 0x14d   :  { %935 = vmatprep.subr.bf16.mxu1 %v1161_v0 }
 0x150   :  { %936 = vmatpush3.bf16.msra.mxu1 %v1021_v50 }
 0x151   :  { %961 = vmatprep.subr.bf16.mxu1 %v1161_v0 }
 0x206   :  { %v272_v43 = vpop.f32.mrb[0].mxu1 }
 0x207   :  { %v273_v44 = vadd.f32 %v762_v42, %v272_v43  ;;  %v899_v45 = vpop.f32.mrb[1].mxu1 }
 0x208   :  { %v275_v46 = vpop.f32.mrb[2].mxu1 }
 0x209   :  { %v278_v47 = vmax.f32 %v273_v44, 0.0  ;;  %v900_v48 = vpop.f32.mrb[3].mxu1 }
 0x20b   :  { %v296_v49 = vpack.c.bf16 %v278_v47, %v278_v47 }
 0x20d   :  { %918 = vmatmul.mubr.bf16.vlgmr.msra.gmra.mrb[4].mxu0 %v296_v49 }
 0x20e   :  { %957 = vmatprep.mubr.msk.bf16.mxu0 %vm1162_vm0, %v1161_v0  ;;  %942 = vmatpush3.bf16.msra.mxu0 %v1022_v51 }
 0x20f   :  { %943 = vmatprep.subr.bf16.mxu0 %v1161_v0 }
 0x212   :  { %944 = vmatpush3.bf16.msra.mxu0 %v1023_v52 }
 0x213   :  { %945 = vmatprep.subr.bf16.mxu0 %v1161_v0 }
 0x216   :  { %946 = vmatpush3.bf16.msra.mxu0 %v1024_v53 }
 0x217   :  { %947 = vmatprep.subr.bf16.mxu0 %v1161_v0 }
 0x21a   :  { %948 = vmatpush3.bf16.msra.mxu0 %v1025_v54 }
 0x21b   :  { %949 = vmatprep.subr.bf16.mxu0 %v1161_v0 }
 0x21e   :  { %950 = vmatpush3.bf16.msra.mxu0 %v1026_v55 }
 0x21f   :  { %951 = vmatprep.subr.bf16.mxu0 %v1161_v0 }
 0x222   :  { %952 = vmatpush3.bf16.msra.mxu0 %v1027_v56 }
 0x223   :  { %953 = vmatprep.subr.bf16.mxu0 %v1161_v0 }
 0x226   :  { %954 = vmatpush3.bf16.msra.mxu0 %v1028_v1 }
 0x227   :  { %955 = vmatprep.subr.bf16.mxu0 %v1161_v0 }
 0x22a   :  { %956 = vmatpush3.bf16.msra.mxu0 %v1029_v2 }
 0x2e0   :  { %v383_v58 = vpop.f32.mrb[4].mxu0 }
 0x2e1   :  { %v384_v59 = vadd.f32 %v771_v57, %v383_v58  ;;  %v919_v60 = vpop.f32.mrb[5].mxu0 }
 0x2e2   :  { %v386_v61 = vpop.f32.mrb[6].mxu0 }
 0x2e3   :  { %v407_v62 = vpack.c.bf16 %v384_v59, %v384_v59  ;;  %389 = vst [vmem:[#allocation8] sm:$0xff] %v384_v59  ;;  %v920_v63 = vpop.f32.mrb[7].mxu0 }
 0x2e5   :  { %938 = vmatmul.mubr.bf16.vlgmr.msra.gmra.mrb[4].mxu1 %v407_v62 }
 0x2e6   :  { %977 = vmatprep.mubr.msk.bf16.mxu1 %vm1162_vm0, %v1161_v0  ;;  %962 = vmatpush3.bf16.msra.mxu1 %v1030_v3 }
 0x2e7   :  { %963 = vmatprep.subr.bf16.mxu1 %v1161_v0 }
 0x2ea   :  { %964 = vmatpush3.bf16.msra.mxu1 %v1031_v4 }
 0x2eb   :  { %965 = vmatprep.subr.bf16.mxu1 %v1161_v0 }
 0x2ee   :  { %966 = vmatpush3.bf16.msra.mxu1 %v1032_v5 }
 0x2ef   :  { %967 = vmatprep.subr.bf16.mxu1 %v1161_v0 }
 0x2f2   :  { %968 = vmatpush3.bf16.msra.mxu1 %v1033_v6 }
 0x2f3   :  { %969 = vmatprep.subr.bf16.mxu1 %v1161_v0 }
 0x2f6   :  { %970 = vmatpush3.bf16.msra.mxu1 %v1034_v7 }
 0x2f7   :  { %971 = vmatprep.subr.bf16.mxu1 %v1161_v0 }
 0x2fa   :  { %972 = vmatpush3.bf16.msra.mxu1 %v1035_v8 }
 0x2fb   :  { %973 = vmatprep.subr.bf16.mxu1 %v1161_v0 }
 0x2fe   :  { %974 = vmatpush3.bf16.msra.mxu1 %v1036_v17 }
 0x2ff   :  { %975 = vmatprep.subr.bf16.mxu1 %v1161_v0 }
 0x302   :  { %976 = vmatpush3.bf16.msra.mxu1 %v1037_v18 }
 0x3b8   :  { %v494_v10 = vpop.f32.mrb[4].mxu1 }
 0x3b9   :  { %v495_v11 = vadd.f32 %v780_v9, %v494_v10  ;;  %v939_v12 = vpop.f32.mrb[5].mxu1 }
 0x3ba   :  { %v497_v13 = vpop.f32.mrb[6].mxu1 }
 0x3bb   :  { %v500_v14 = vmax.f32 %v495_v11, 0.0  ;;  %v940_v15 = vpop.f32.mrb[7].mxu1 }
 0x3bd   :  { %v518_v16 = vpack.c.bf16 %v500_v14, %v500_v14 }
 0x3bf   :  { %958 = vmatmul.mubr.bf16.vlgmr.msra.gmra.mrb[8].mxu0 %v518_v16 }
 0x492   :  { %v605_v20 = vpop.f32.mrb[8].mxu0 }
 0x493   :  { %v606_v21 = vadd.f32 %v789_v19, %v605_v20  ;;  %v959_v22 = vpop.f32.mrb[9].mxu0 }
 0x494   :  { %v608_v23 = vpop.f32.mrb[10].mxu0 }
 0x495   :  { %v611_v24 = vmax.f32 %v606_v21, 0.0  ;;  %v960_v25 = vpop.f32.mrb[11].mxu0 }
 0x497   :  { %v629_v26 = vpack.c.bf16 %v611_v24, %v611_v24 }
 0x499   :  { %978 = vmatmul.mubr.bf16.vlgmr.msra.gmra.mrb[8].mxu1 %v629_v26 }
 0x49a   :  { %1115 = shalt.err (!%p1112_p0)
}
 0x49b   :  { %s1116_s29 = scalar_lea.hbm %s1313_s3, 128 }
 0x49c   :  { %p1117_p1 = scmp.ne.s32.totalorder %s1313_s3, %s1116_s29  ;;  %p1120_p2 = scmp.lt.u32.totalorder %s1116_s29, %s1313_s3 }
 0x49e   :  { %p1122_p3 = pnand %p1120_p2, %p1117_p1 }
 0x4a0   :  { %1125 = shalt.err (!%p1122_p3)
}
 0x4a1   :  { %732 = dma.vmem_to_hbm [thread:$0]  %s730_s25, 128, %s1313_s3, [#allocation4]   ;;  %v798_v0 = vld [vmem:[#allocation7 + $0x5] ss:$0 sm:$0xff] }
 0x4a2   :  { %s1164_s10 = smov [#allocation9]  }
 0x4a3   :  { %s739_s11 = sshll.u32 %s1164_s10, 4  ;;  %s740_s11 = int_to_ptr.vmem [resolvable:$true] %s739_s11 }
 0x4a4   :  { %s1126_s12 = scalar_lea.vmem %s740_s11, 128  ;;  %p1131_p5 = scmp.lt.s32.totalorder %s740_s11, %s740_s11 }
 0x4a5   :  { %p1127_p4 = scmp.ne.s32.totalorder %s740_s11, %s1126_s12  ;;  %p1132_p6 = scmp.lt.s32.totalorder %s1126_s12, %s1126_s12 }
 0x4a7   :  { %p1133_p7 = por %p1132_p6, %p1131_p5 }
 0x4a9   :  { %p1134_p8 = pnand %p1133_p7, %p1127_p4 }
 0x56c   :  { %v716_v27 = vpop.f32.mrb[8].mxu1 }
 0x56d   :  { %v717_v28 = vadd.f32 %v798_v0, %v716_v27  ;;  %v979_v29 = vpop.f32.mrb[9].mxu1 }
 0x56e   :  { %v719_v30 = vpop.f32.mrb[10].mxu1 }
 0x56f   :  { %722 = vst [vmem:[#allocation9] sm:$0xff] %v717_v28  ;;  %v980_v31 = vpop.f32.mrb[11].mxu1 }
 0x570   :  { %1137 = shalt.err (!%p1134_p8)
}
 0x571   :  { %s1138_s3 = scalar_lea.hbm %s1314_s4, 128 }
 0x572   :  { %p1139_p9 = scmp.ne.s32.totalorder %s1314_s4, %s1138_s3  ;;  %p1142_p10 = scmp.lt.u32.totalorder %s1138_s3, %s1314_s4 }
 0x574   :  { %p1144_p11 = pnand %p1142_p10, %p1139_p9 }
 0x576   :  { %1147 = shalt.err (!%p1144_p11)
}
 0x577   :  { %742 = dma.vmem_to_hbm [thread:$0]  %s740_s11, 128, %s1314_s4, [#allocation10]  }
 0x578   :  { %1152 = dma.done.wait [#allocation4], 128  }
 0x579   :  { %1153 = vsyncadd [#allocation4], 4294967168 }
 0x57a   :  { %1154 = dma.done.wait [#allocation10], 128  }
 0x57b   :  { %1155 = vsyncadd [#allocation10], 4294967168 }
 0x57c   :  { %749 = vsyncpa [#allocation3], 1 }
 0x57d   :  { %750 = vsyncpa [#allocation6], 1 }
 0x57e   :  { %751 = vsyncpa [#allocation4], 1 }
 0x57f   :  { %752 = vsyncpa [#allocation10], 1 }

</bundles_post_ra>
